<compile_context>
chip_gen: v6e
topology: v6e:2x2x1
jax: 0.10.0
libtpu: 0.0.40
codegen_flags: <defaults>
</compile_context>

<pallas_src>
import jax
import jax.numpy as jnp
import numpy as np
from jax import lax
from jax.experimental import pallas as pl
from jax.experimental.pallas import tpu as pltpu


def basic_block_kernel(xpad_ref, w1_ref, w2_ref, b1_ref, b2_ref,
                       out_ref, mid_ref):
    """One image per grid step.  All refs are row-flattened (lane-dense):

      xpad_ref : (1, H+2, W*Cin)  f32   H-padded input (also the residual)
      w1_ref   : (3, W*Cin,  W*Cout)    banded conv1 weights (BN1 scale folded)
      w2_ref   : (3, W*Cout, W*Cout)    banded conv2 weights (BN2 scale folded)
      b1_ref   : (1, W*Cout) f32        BN1 bias tiled along W
      b2_ref   : (1, W*Cout) f32        BN2 bias tiled along W
      out_ref  : (1, H, W*Cout) f32
      mid_ref  : (H+2, W*Cout) scratch  H-zero-padded conv1 output
    """
    H = out_ref.shape[1]
    n_wc = out_ref.shape[2]                      # W * Cout  (== W * Cin)
    mxu_dtype = w1_ref.dtype

    # Zero only the two halo rows of the intermediate scratch (its interior is
    # fully rewritten below) — full-lane, unmasked stores.
    mid_ref[0:1, :] = jnp.zeros((1, n_wc), mxu_dtype)
    mid_ref[H + 1:H + 2, :] = jnp.zeros((1, n_wc), mxu_dtype)

    # Cast the whole padded input tile to the MXU dtype once.
    xv = xpad_ref[0].astype(mxu_dtype)           # (H+2, W*Cin)

    # ---- conv1 (+ folded BN1 scale): 3 MXU matmuls, K = W*Cin, N = W*Cout ----
    acc1 = jnp.zeros((H, n_wc), jnp.float32)
    for dh in range(3):
        acc1 = acc1 + jnp.dot(xv[dh:dh + H, :], w1_ref[dh],
                              preferred_element_type=jnp.float32)

    # BN1 bias + ReLU, stage the H-padded intermediate for conv2
    # (lane-aligned, unmasked 128-lane store).
    out1 = jnp.maximum(acc1 + b1_ref[...], 0.0)
    mid_ref[1:H + 1, :] = out1.astype(mxu_dtype)

    # ---- conv2 (+ folded BN2 scale) ------------------------------------------
    acc2 = jnp.zeros((H, n_wc), jnp.float32)
    for dh in range(3):
        acc2 = acc2 + jnp.dot(mid_ref[dh:dh + H, :], w2_ref[dh],
                              preferred_element_type=jnp.float32)

    # BN2 bias + residual (read from the interior of the H-padded input, exact
    # f32 — no second copy of x is DMA'd) + ReLU; fully lane-dense store.
    res = xpad_ref[0, 1:H + 1, :]
    out_ref[0, :, :] = jnp.maximum(acc2 + b2_ref[...] + res, 0.0)


def _banded_conv_weights(w_hwio, width):
    """(3,3,Cin,Cout) HWIO weights -> 3 banded matrices (width*Cin, width*Cout).

    BigW[dh][a*Cin+ci, w*Cout+co] = w[dh, a-w+1, ci, co]  if 0 <= a-w+1 <= 2
    (and 0 <= a < width), else 0.  Out-of-range W taps (which would multiply
    the zero padding) are simply dropped, so the data needs NO W padding:
        out_row[h] = sum_{dh} row_{h+dh} @ BigW[dh]     (rows H-padded only)
    is exactly the stride-1 / pad-1 3x3 conv.
    """
    kh, kw, cin, cout = w_hwio.shape
    assert kh == 3 and kw == 3
    sel = np.zeros((3, width, width), dtype=np.float32)
    for dw in range(3):
        for w in range(width):
            a = w + dw - 1
            if 0 <= a < width:
                sel[dw, a, w] = 1.0
    big = jnp.einsum('dab,hdio->haibo', sel, w_hwio)     # (3, W, Cin, W, Cout)
    return big.reshape(3, width * cin, width * cout)


def basic_block_pallas(x_nchw, w1_oihw, w2_oihw, bn1, bn2, eps=1e-5,
                       mxu_dtype=jnp.bfloat16):
    """Fused BasicBlock forward (eval-mode BN, stride=1, downsample=None)."""
    g1, be1, m1, v1 = bn1
    g2, be2, m2, v2 = bn2
    # Fold eval-mode BN into a per-channel scale (folded into the conv weights
    # below) and a per-channel bias (added in the kernel).
    s1 = g1 / jnp.sqrt(v1 + eps)
    b1 = be1 - m1 * s1
    s2 = g2 / jnp.sqrt(v2 + eps)
    b2 = be2 - m2 * s2

    x = jnp.transpose(x_nchw, (0, 2, 3, 1)).astype(jnp.float32)   # NHWC
    B, H, W, Cin = x.shape
    Cout = w1_oihw.shape[0]
    assert Cin == Cout, "residual add needs inplanes == planes (downsample=None)"

    # TODO(synk): keep the surrounding model NHWC end-to-end so this transpose
    #             + pad (and the final transpose) stop costing extra HBM passes.
    xpad = jnp.pad(x, ((0, 0), (1, 1), (0, 0), (0, 0)))            # pad H only
    xpad = xpad.reshape(B, H + 2, W * Cin)                         # row-flattened

    # HWIO weights with BN scale folded into the output channel, turned into
    # banded row-conv matrices and cast to the MXU dtype (bf16 on v6e/v7x).
    w1_hwio = jnp.transpose(w1_oihw, (2, 3, 1, 0)) * s1
    w2_hwio = jnp.transpose(w2_oihw, (2, 3, 1, 0)) * s2
    w1_big = _banded_conv_weights(w1_hwio, W).astype(mxu_dtype)
    w2_big = _banded_conv_weights(w2_hwio, W).astype(mxu_dtype)

    b1_flat = jnp.tile(b1, W).reshape(1, W * Cout).astype(jnp.float32)
    b2_flat = jnp.tile(b2, W).reshape(1, W * Cout).astype(jnp.float32)

    out_flat = pl.pallas_call(
        basic_block_kernel,
        out_shape=jax.ShapeDtypeStruct((B, H, W * Cout), jnp.float32),
        grid_spec=pltpu.PrefetchScalarGridSpec(
            num_scalar_prefetch=0,
            grid=(B,),
            in_specs=[
                pl.BlockSpec((1, H + 2, W * Cin), lambda b: (b, 0, 0)),
                pl.BlockSpec((3, W * Cin, W * Cout), lambda b: (0, 0, 0)),
                pl.BlockSpec((3, W * Cout, W * Cout), lambda b: (0, 0, 0)),
                pl.BlockSpec((1, W * Cout), lambda b: (0, 0)),
                pl.BlockSpec((1, W * Cout), lambda b: (0, 0)),
            ],
            out_specs=pl.BlockSpec((1, H, W * Cout), lambda b: (b, 0, 0)),
            scratch_shapes=[pltpu.VMEM((H + 2, W * Cout), mxu_dtype)],
        ),
        compiler_params=pltpu.CompilerParams(
            dimension_semantics=("parallel",),
        ),
    )(xpad, w1_big, w2_big, b1_flat, b2_flat)

    out = out_flat.reshape(B, H, W, Cout)
    return jnp.transpose(out, (0, 3, 1, 2))               # back to NCHW


def basic_block_ref(x, w1, w2, bn1, bn2, eps=1e-5):
    """Pure-JAX reference (NCHW, f32, eval-mode BN)."""
    g1, be1, m1, v1 = bn1
    g2, be2, m2, v2 = bn2

    def conv(inp, w):
        return lax.conv_general_dilated(
            inp, w, window_strides=(1, 1), padding=((1, 1), (1, 1)),
            dimension_numbers=('NCHW', 'OIHW', 'NCHW'),
            precision=lax.Precision.HIGHEST)

    def bn(inp, g, be, m, v):
        c = g.shape[0]
        return ((inp - m.reshape(1, c, 1, 1))
                / jnp.sqrt(v.reshape(1, c, 1, 1) + eps)
                * g.reshape(1, c, 1, 1) + be.reshape(1, c, 1, 1))

    out = jnp.maximum(bn(conv(x, w1), g1, be1, m1, v1), 0.0)
    out = bn(conv(out, w2), g2, be2, m2, v2)
    return jnp.maximum(out + x, 0.0)


if __name__ == "__main__":
    B, C, H, W = 2, 8, 16, 16   # inplanes = planes = 8, stride=1, downsample=None
    key = jax.random.PRNGKey(0)
    keys = jax.random.split(key, 10)

    x = jax.random.normal(keys[0], (B, C, H, W), dtype=jnp.float32)
    w1 = 0.1 * jax.random.normal(keys[1], (C, C, 3, 3), dtype=jnp.float32)
    w2 = 0.1 * jax.random.normal(keys[2], (C, C, 3, 3), dtype=jnp.float32)

    bn1 = (1.0 + 0.1 * jax.random.normal(keys[3], (C,), dtype=jnp.float32),  # gamma
           0.1 * jax.random.normal(keys[4], (C,), dtype=jnp.float32),        # beta
           0.1 * jax.random.normal(keys[5], (C,), dtype=jnp.float32),        # running_mean
           1.0 + 0.1 * jax.nn.softplus(jax.random.normal(keys[6], (C,))))    # running_var
    bn2 = (1.0 + 0.1 * jax.random.normal(keys[7], (C,), dtype=jnp.float32),
           0.1 * jax.random.normal(keys[8], (C,), dtype=jnp.float32),
           0.1 * jax.random.normal(keys[9], (C,), dtype=jnp.float32),
           1.0 + 0.1 * jax.nn.softplus(jax.random.normal(keys[6], (C,)) + 1.0))

    ref = jax.block_until_ready(basic_block_ref(x, w1, w2, bn1, bn2))

    # f32 MXU path: tight tolerance.
    out_f32 = jax.block_until_ready(
        basic_block_pallas(x, w1, w2, bn1, bn2, mxu_dtype=jnp.float32))
    np.testing.assert_allclose(np.asarray(out_f32), np.asarray(ref),
                               rtol=2e-3, atol=2e-3)

    # bf16 MXU path (default, preferred on v6e/v7x): operands are rounded to
    # bf16 before the matmuls (f32 accumulation), so the tolerance is looser.
    out_bf16 = jax.block_until_ready(basic_block_pallas(x, w1, w2, bn1, bn2))
    np.testing.assert_allclose(np.asarray(out_bf16), np.asarray(ref),
                               rtol=3e-2, atol=3e-2)

    print("KERNEL_OK")
</pallas_src>

<mosaic_0001>
module attributes {stable_mosaic.version = 11 : i64} {
  func.func @basic_block_kernel(%arg0: i32, %arg1: memref<1x18x128xf32, #tpu.memory_space<vmem>>, %arg2: memref<3x128x128xf32, #tpu.memory_space<vmem>>, %arg3: memref<3x128x128xf32, #tpu.memory_space<vmem>>, %arg4: memref<1x128xf32, #tpu.memory_space<vmem>>, %arg5: memref<1x128xf32, #tpu.memory_space<vmem>>, %arg6: memref<1x16x128xf32, #tpu.memory_space<vmem>>, %arg7: memref<18x128xf32, #tpu.memory_space<vmem>>) attributes {dimension_semantics = [#tpu.dimension_semantics<parallel>], iteration_bounds = array<i64: 2>, scalar_prefetch = 0 : i64, scratch_operands = 1 : i64, tpu.core_type = #tpu.core_type<tc>, window_params = [{transform_indices = @transform_0, window_bounds = array<i64: 1, 18, 128>}, {pipeline_mode = #tpu.pipeline_mode<synchronous>, transform_indices = @transform_1, window_bounds = array<i64: 3, 128, 128>}, {pipeline_mode = #tpu.pipeline_mode<synchronous>, transform_indices = @transform_2, window_bounds = array<i64: 3, 128, 128>}, {pipeline_mode = #tpu.pipeline_mode<synchronous>, transform_indices = @transform_3, window_bounds = array<i64: 1, 128>}, {pipeline_mode = #tpu.pipeline_mode<synchronous>, transform_indices = @transform_4, window_bounds = array<i64: 1, 128>}, {transform_indices = @transform_5, window_bounds = array<i64: 1, 16, 128>}]} {
    %cst = arith.constant 0.000000e+00 : f32
    %0 = vector.broadcast %cst : f32 to vector<1x128xf32>
    %c0 = arith.constant 0 : index
    %c0_0 = arith.constant 0 : index
    %1 = vector.load %arg7[%c0, %c0_0] : memref<18x128xf32, #tpu.memory_space<vmem>>, vector<1x128xf32>
    tpu.vector_store %arg7[%c0, %c0_0], %0 {strides = array<i32>} : memref<18x128xf32, #tpu.memory_space<vmem>>, vector<1x128xf32>,
    %cst_1 = arith.constant 0.000000e+00 : f32
    %2 = vector.broadcast %cst_1 : f32 to vector<1x128xf32>
    %c17 = arith.constant 17 : index
    %c0_2 = arith.constant 0 : index
    %3 = vector.load %arg7[%c17, %c0_2] : memref<18x128xf32, #tpu.memory_space<vmem>>, vector<1x128xf32>
    tpu.vector_store %arg7[%c17, %c0_2], %2 {strides = array<i32>} : memref<18x128xf32, #tpu.memory_space<vmem>>, vector<1x128xf32>,
    %c0_3 = arith.constant 0 : index
    %c0_4 = arith.constant 0 : index
    %c0_5 = arith.constant 0 : index
    %4 = vector.load %arg1[%c0_3, %c0_4, %c0_5] : memref<1x18x128xf32, #tpu.memory_space<vmem>>, vector<1x18x128xf32>
    %5 = vector.shape_cast %4 : vector<1x18x128xf32> to vector<18x128xf32>
    %cst_6 = arith.constant 0.000000e+00 : f32
    %6 = vector.broadcast %cst_6 : f32 to vector<16x128xf32>
    %7 = vector.extract_strided_slice %5 {offsets = [0, 0], sizes = [16, 128], strides = [1, 1]} : vector<18x128xf32> to vector<16x128xf32>
    %c0_7 = arith.constant 0 : index
    %c0_8 = arith.constant 0 : index
    %c0_9 = arith.constant 0 : index
    %8 = vector.load %arg2[%c0_7, %c0_8, %c0_9] : memref<3x128x128xf32, #tpu.memory_space<vmem>>, vector<1x128x128xf32>
    %9 = vector.shape_cast %8 : vector<1x128x128xf32> to vector<128x128xf32>
    %cst_10 = arith.constant dense<0.000000e+00> : vector<16x128xf32>
    %10 = tpu.matmul %7, %9, %cst_10 {dimension_numbers = #tpu.dot_dimension_numbers<[1], [0], [0], [1], [0, 0, 1, 1], [], []>} : vector<16x128xf32>, vector<128x128xf32>, vector<16x128xf32> -> vector<16x128xf32>
    %11 = arith.addf %6, %10 : vector<16x128xf32>
    %12 = vector.extract_strided_slice %5 {offsets = [1, 0], sizes = [16, 128], strides = [1, 1]} : vector<18x128xf32> to vector<16x128xf32>
    %c1 = arith.constant 1 : index
    %c0_11 = arith.constant 0 : index
    %c0_12 = arith.constant 0 : index
    %13 = vector.load %arg2[%c1, %c0_11, %c0_12] : memref<3x128x128xf32, #tpu.memory_space<vmem>>, vector<1x128x128xf32>
    %14 = vector.shape_cast %13 : vector<1x128x128xf32> to vector<128x128xf32>
    %cst_13 = arith.constant dense<0.000000e+00> : vector<16x128xf32>
    %15 = tpu.matmul %12, %14, %cst_13 {dimension_numbers = #tpu.dot_dimension_numbers<[1], [0], [0], [1], [0, 0, 1, 1], [], []>} : vector<16x128xf32>, vector<128x128xf32>, vector<16x128xf32> -> vector<16x128xf32>
    %16 = arith.addf %11, %15 : vector<16x128xf32>
    %17 = vector.extract_strided_slice %5 {offsets = [2, 0], sizes = [16, 128], strides = [1, 1]} : vector<18x128xf32> to vector<16x128xf32>
    %c2 = arith.constant 2 : index
    %c0_14 = arith.constant 0 : index
    %c0_15 = arith.constant 0 : index
    %18 = vector.load %arg2[%c2, %c0_14, %c0_15] : memref<3x128x128xf32, #tpu.memory_space<vmem>>, vector<1x128x128xf32>
    %19 = vector.shape_cast %18 : vector<1x128x128xf32> to vector<128x128xf32>
    %cst_16 = arith.constant dense<0.000000e+00> : vector<16x128xf32>
    %20 = tpu.matmul %17, %19, %cst_16 {dimension_numbers = #tpu.dot_dimension_numbers<[1], [0], [0], [1], [0, 0, 1, 1], [], []>} : vector<16x128xf32>, vector<128x128xf32>, vector<16x128xf32> -> vector<16x128xf32>
    %21 = arith.addf %16, %20 : vector<16x128xf32>
    %c0_17 = arith.constant 0 : index
    %c0_18 = arith.constant 0 : index
    %22 = vector.load %arg4[%c0_17, %c0_18] : memref<1x128xf32, #tpu.memory_space<vmem>>, vector<1x128xf32>
    %23 = vector.broadcast %22 : vector<1x128xf32> to vector<16x128xf32>
    %24 = arith.addf %21, %23 : vector<16x128xf32>
    %cst_19 = arith.constant 0.000000e+00 : f32
    %25 = vector.broadcast %cst_19 : f32 to vector<16x128xf32>
    %26 = arith.maximumf %24, %25 : vector<16x128xf32>
    %c1_20 = arith.constant 1 : index
    %c0_21 = arith.constant 0 : index
    %27 = vector.load %arg7[%c1_20, %c0_21] : memref<18x128xf32, #tpu.memory_space<vmem>>, vector<16x128xf32>
    tpu.vector_store %arg7[%c1_20, %c0_21], %26 {strides = array<i32>} : memref<18x128xf32, #tpu.memory_space<vmem>>, vector<16x128xf32>,
    %cst_22 = arith.constant 0.000000e+00 : f32
    %28 = vector.broadcast %cst_22 : f32 to vector<16x128xf32>
    %c0_23 = arith.constant 0 : index
    %c0_24 = arith.constant 0 : index
    %29 = vector.load %arg7[%c0_23, %c0_24] : memref<18x128xf32, #tpu.memory_space<vmem>>, vector<16x128xf32>
    %c0_25 = arith.constant 0 : index
    %c0_26 = arith.constant 0 : index
    %c0_27 = arith.constant 0 : index
    %30 = vector.load %arg3[%c0_25, %c0_26, %c0_27] : memref<3x128x128xf32, #tpu.memory_space<vmem>>, vector<1x128x128xf32>
    %31 = vector.shape_cast %30 : vector<1x128x128xf32> to vector<128x128xf32>
    %cst_28 = arith.constant dense<0.000000e+00> : vector<16x128xf32>
    %32 = tpu.matmul %29, %31, %cst_28 {dimension_numbers = #tpu.dot_dimension_numbers<[1], [0], [0], [1], [0, 0, 1, 1], [], []>} : vector<16x128xf32>, vector<128x128xf32>, vector<16x128xf32> -> vector<16x128xf32>
    %33 = arith.addf %28, %32 : vector<16x128xf32>
    %c1_29 = arith.constant 1 : index
    %c0_30 = arith.constant 0 : index
    %34 = vector.load %arg7[%c1_29, %c0_30] : memref<18x128xf32, #tpu.memory_space<vmem>>, vector<16x128xf32>
    %c1_31 = arith.constant 1 : index
    %c0_32 = arith.constant 0 : index
    %c0_33 = arith.constant 0 : index
    %35 = vector.load %arg3[%c1_31, %c0_32, %c0_33] : memref<3x128x128xf32, #tpu.memory_space<vmem>>, vector<1x128x128xf32>
    %36 = vector.shape_cast %35 : vector<1x128x128xf32> to vector<128x128xf32>
    %cst_34 = arith.constant dense<0.000000e+00> : vector<16x128xf32>
    %37 = tpu.matmul %34, %36, %cst_34 {dimension_numbers = #tpu.dot_dimension_numbers<[1], [0], [0], [1], [0, 0, 1, 1], [], []>} : vector<16x128xf32>, vector<128x128xf32>, vector<16x128xf32> -> vector<16x128xf32>
    %38 = arith.addf %33, %37 : vector<16x128xf32>
    %c2_35 = arith.constant 2 : index
    %c0_36 = arith.constant 0 : index
    %39 = vector.load %arg7[%c2_35, %c0_36] : memref<18x128xf32, #tpu.memory_space<vmem>>, vector<16x128xf32>
    %c2_37 = arith.constant 2 : index
    %c0_38 = arith.constant 0 : index
    %c0_39 = arith.constant 0 : index
    %40 = vector.load %arg3[%c2_37, %c0_38, %c0_39] : memref<3x128x128xf32, #tpu.memory_space<vmem>>, vector<1x128x128xf32>
    %41 = vector.shape_cast %40 : vector<1x128x128xf32> to vector<128x128xf32>
    %cst_40 = arith.constant dense<0.000000e+00> : vector<16x128xf32>
    %42 = tpu.matmul %39, %41, %cst_40 {dimension_numbers = #tpu.dot_dimension_numbers<[1], [0], [0], [1], [0, 0, 1, 1], [], []>} : vector<16x128xf32>, vector<128x128xf32>, vector<16x128xf32> -> vector<16x128xf32>
    %43 = arith.addf %38, %42 : vector<16x128xf32>
    %c0_41 = arith.constant 0 : index
    %c1_42 = arith.constant 1 : index
    %c0_43 = arith.constant 0 : index
    %44 = vector.load %arg1[%c0_41, %c1_42, %c0_43] : memref<1x18x128xf32, #tpu.memory_space<vmem>>, vector<1x16x128xf32>
    %45 = vector.shape_cast %44 : vector<1x16x128xf32> to vector<16x128xf32>
    %c0_44 = arith.constant 0 : index
    %c0_45 = arith.constant 0 : index
    %46 = vector.load %arg5[%c0_44, %c0_45] : memref<1x128xf32, #tpu.memory_space<vmem>>, vector<1x128xf32>
    %47 = vector.broadcast %46 : vector<1x128xf32> to vector<16x128xf32>
    %48 = arith.addf %43, %47 : vector<16x128xf32>
    %49 = arith.addf %48, %45 : vector<16x128xf32>
    %cst_46 = arith.constant 0.000000e+00 : f32
    %50 = vector.broadcast %cst_46 : f32 to vector<16x128xf32>
    %51 = arith.maximumf %49, %50 : vector<16x128xf32>
    %c0_47 = arith.constant 0 : index
    %c0_48 = arith.constant 0 : index
    %c0_49 = arith.constant 0 : index
    %52 = vector.load %arg6[%c0_47, %c0_48, %c0_49] : memref<1x16x128xf32, #tpu.memory_space<vmem>>, vector<1x16x128xf32>
    %53 = vector.shape_cast %52 : vector<1x16x128xf32> to vector<16x128xf32>
    %54 = vector.shape_cast %51 : vector<16x128xf32> to vector<1x16x128xf32>
    tpu.vector_store %arg6[%c0_47, %c0_48, %c0_49], %54 {strides = array<i32>} : memref<1x16x128xf32, #tpu.memory_space<vmem>>, vector<1x16x128xf32>,
    return
  }
  func.func @transform_0(%arg0: i32) -> (i32, i32, i32) {
    %c0_i32 = arith.constant 0 : i32
    %c0_i32_0 = arith.constant 0 : i32
    %c0_i32_1 = arith.constant 0 : i32
    return %arg0, %c0_i32, %c0_i32_0 : i32, i32, i32
  }
  func.func @transform_1(%arg0: i32) -> (i32, i32, i32) {
    %c0_i32 = arith.constant 0 : i32
    %c0_i32_0 = arith.constant 0 : i32
    %c0_i32_1 = arith.constant 0 : i32
    %c0_i32_2 = arith.constant 0 : i32
    return %c0_i32, %c0_i32_0, %c0_i32_1 : i32, i32, i32
  }
  func.func @transform_2(%arg0: i32) -> (i32, i32, i32) {
    %c0_i32 = arith.constant 0 : i32
    %c0_i32_0 = arith.constant 0 : i32
    %c0_i32_1 = arith.constant 0 : i32
    %c0_i32_2 = arith.constant 0 : i32
    return %c0_i32, %c0_i32_0, %c0_i32_1 : i32, i32, i32
  }
  func.func @transform_3(%arg0: i32) -> (i32, i32) {
    %c0_i32 = arith.constant 0 : i32
    %c0_i32_0 = arith.constant 0 : i32
    %c0_i32_1 = arith.constant 0 : i32
    return %c0_i32, %c0_i32_0 : i32, i32
  }
  func.func @transform_4(%arg0: i32) -> (i32, i32) {
    %c0_i32 = arith.constant 0 : i32
    %c0_i32_0 = arith.constant 0 : i32
    %c0_i32_1 = arith.constant 0 : i32
    return %c0_i32, %c0_i32_0 : i32, i32
  }
  func.func @transform_5(%arg0: i32) -> (i32, i32, i32) {
    %c0_i32 = arith.constant 0 : i32
    %c0_i32_0 = arith.constant 0 : i32
    %c0_i32_1 = arith.constant 0 : i32
    return %arg0, %c0_i32, %c0_i32_0 : i32, i32, i32
  }
}

</mosaic_0001>

<bundles_post_ra>
// kernel: tpu_custom_call.1
= control target key start
LH: loop header
LB: loop body
LE: loop exit
PB: predicated region body
PF: predicated region fallthrough
CT: control target
= control target key end

     0   :  { %10 = vsyncpa [#allocation4], 0  ;;  %s1700_s0 = inlined_call_operand.vmem [shape: f32[2,18,128], index: 0, kind: input, shape index: {}]   ;;  %s1701_s1 = inlined_call_operand.hbm [shape: f32[3,128,128], index: 1, kind: input, shape index: {}]   ;;  %s1702_s2 = inlined_call_operand.hbm [shape: f32[3,128,128], index: 2, kind: input, shape index: {}]   ;;  %s1703_s3 = inlined_call_operand.vmem [shape: f32[1,128], index: 3, kind: input, shape index: {}]   ;;  %s1704_s4 = inlined_call_operand.vmem [shape: f32[1,128], index: 4, kind: input, shape index: {}]   ;;  %s1705_s5 = inlined_call_operand.hbm [shape: f32[2,16,128], index: 5, kind: output, shape index: {}]  }
   0x1   :  { %11 = vsyncpa [#allocation7], 0 }
   0x2   :  { %12 = vsyncpa [#allocation5], 0 }
   0x3   :  { %14 = vsyncpa [#allocation5 + $0x1], 0  ;;  %s1527_s18 = smov 0   ;;  %s1529_s19 = smov 0  }
   0x4   :  { %s1531_s20 = smov 0   ;;  %s1533_s21 = smov 0  }
   0x5 LB: > { %s1548_s22 = sadd.s32 4294967295, %s1487_s21   ;;  %s965_s23 = sadd.s32 4294967294, %s1487_s21   ;;  %s1487_s21 = sphi %s1533_s21, %s1719_s21   ;;  %s1483_s20 = sphi %s1531_s20, %s1718_s20   ;;  %s1479_s19 = sphi %s1529_s19, %s1717_s19   ;;  %s1475_s18 = sphi %s1527_s18, %s1716_s18  }
   0x6   : > { %s1552_s24 = sadd.s32 1, %s1487_s21   ;;  %s137_s25 = sadd.s32 1, %s1483_s20 }
   0x7   : > { %s134_s26 = ssub.s32 %s1487_s21, %s1552_s24  ;;  %p147_p0 = scmp.ne.s32.totalorder %s1483_s20, %s1479_s19 }
   0x8   : > { %p135_p1 = scmp.eq.s32.totalorder %s134_s26, 0  ;;  %p148_p2 = scmp.eq.s32.totalorder %s1548_s22, 1 }
   0x9   : > { %p153_p3 = scmp.ne.s32.totalorder %s1479_s19, %s1475_s18  ;;  %p154_p4 = scmp.eq.s32.totalorder %s965_s23, 1 }
   0xa   : > { %s1563_s27 = scalar_select %p135_p1, %s1483_s20, %s137_s25  }
   0xb   : > { %p1565_p5 = por %p148_p2, %p147_p0  ;;  %p1569_p6 = por %p154_p4, %p153_p3 }
   0xc   : > { %p966_p7 = scmp.ge.s32.totalorder %s1487_s21, 1  ;;  %p161_p8 = scmp.lt.s32.totalorder %s1487_s21, 3 }
   0xd   : > { %s1708_s29 = scalar_select %p1569_p6, 1, 0 }
   0xe   : > { %p1706_p9 = scmp.eq.s32.totalorder %s1548_s22, 0  ;;  %p1576_p10 = pnand %p966_p7, %p161_p8 }
   0xf   : > { %s1489_s6 = smov [#allocation3]   ;;  %s1490_s9 = smov [#allocation6]  }
  0x10   : > { %s173_s7 = sshll.u32 %s1489_s6, 4  ;;  %p1312_p11 = pneg %p1576_p10  ;;  %s174_s7 = int_to_ptr.vmem [resolvable:$true] %s173_s7 }
  0x11   : > { %s186_s10 = sshll.u32 %s1490_s9, 4  ;;  %s1378_s11 = scalar_lea.vmem %s174_s7, 6144  ;;  %s187_s10 = int_to_ptr.vmem [resolvable:$true] %s186_s10 }
  0x12   : > { %p1584_p12 = pnand %p1706_p9, %p1312_p11  ;;  %p1379_p0 = scmp.ne.s32.totalorder %s174_s7, %s1378_s11 }
  0x13   : > { %p1386_p3 = scmp.lt.s32.totalorder %s174_s7, %s174_s7  ;;  %p1387_p4 = scmp.lt.s32.totalorder %s1378_s11, %s1378_s11 }
  0x14   : > { %p1369_p13 = pneg %p1584_p12 }
  0x15   : > { %p1388_p7 = por %p1387_p4, %p1386_p3 }
  0x16   : > { %p1381_p1 = pnand %p1379_p0, %p1369_p13 }
  0x18   : > { %p1382_p2 = pneg %p1381_p1 }
  0x1a   : > { %p1389_p8 = pnand %p1388_p7, %p1382_p2 }
  0x1c   : > { %1392 = shalt.err (!%p1389_p8)
}
  0x1d   : > { %s1491_s12 = smov 128   ;;  %s1492_s13 = smov 8  }
  0x1e   : > { %1315 = dma.hbm_to_vmem [thread:$0]  (!%p1584_p12), %s1701_s1, 6144, %s174_s7, [#allocation4], %s1491_s12, %s1491_s12, %s1492_s13  }
  0x1f   : > { %s1404_s16 = scalar_lea.vmem %s187_s10, 6144  ;;  %p1412_p9 = scmp.lt.s32.totalorder %s187_s10, %s187_s10 }
  0x20   : > { %p1405_p11 = scmp.ne.s32.totalorder %s187_s10, %s1404_s16  ;;  %p1413_p6 = scmp.lt.s32.totalorder %s1404_s16, %s1404_s16 }
  0x22   : > { %p1407_p0 = pnand %p1405_p11, %p1369_p13  ;;  %p1414_p3 = por %p1413_p6, %p1412_p9 }
  0x24   : > { %p1408_p1 = pneg %p1407_p0 }
  0x26   : > { %p1415_p2 = pnand %p1414_p3, %p1408_p1 }
  0x28   : > { %1418 = shalt.err (!%p1415_p2)
}
  0x29   : > { %1318 = dma.hbm_to_vmem [thread:$0]  (!%p1584_p12), %s1702_s2, 6144, %s187_s10, [#allocation7], %s1491_s12, %s1491_s12, %s1492_s13  }
  0x2a   : > { %216 = sbr.rel (%p1576_p10) target bundleno = 570 (0x23a), region = 40  ;;  %p1711_p4 = scmp.eq.s32.totalorder (!%p1576_p10), %s1548_s22, 0 }
  0x2f   : > { %1462 = dma.done.wait (%p1711_p4), [#allocation4], 6144   ;;  %p1712_p13 = pmov %p1711_p4 }
  0x30   : > { %p1713_p7 = pmov %p1711_p4 }
  0x31   : > { %1464 = vsyncadd (%p1712_p13), [#allocation4], 4294961152 }
  0x32   : > { %1466 = dma.done.wait (%p1713_p7), [#allocation7], 6144   ;;  %p1714_p6 = pmov %p1711_p4 }
  0x33   : > { %v290_v0 = vld [vmem:[#allocation3 + $0xf8] sm:$0xff]  ;;  %v289_v2 = vld [vmem:[#allocation3 + $0xf0] sm:$0xff]  ;;  %v288_v4 = vld [vmem:[#allocation3 + $0xe8] sm:$0xff]  ;;  %p248_p9 = scmp.lt.s32.totalorder %s1548_s22, 1  ;;  %vm294_vm0 = vcmask 1046528   ;;  %vm469_vm1 = vcmask 1045504  }
  0x34   : > { %1468 = vsyncadd (%p1714_p6), [#allocation7], 4294961152  ;;  %v273_v1 = vld [vmem:[#allocation3 + $0x78] sm:$0xff]  ;;  %1091 = vmatprep.subr.mxu0 %v290_v0  ;;  %v272_v3 = vld [vmem:[#allocation3 + $0x70] sm:$0xff]  ;;  %s245_s10 = sand.u32 1, %s1479_s19   ;;  %s982_s16 = sshll.u32 %s1548_s22, 8 }
  0x35   : > { %1126 = vmatprep.subr.mxu1 %v273_v1  ;;  %1092 = vmatpush3.msra.mxu0 %v290_v0  ;;  %v271_v5 = vld [vmem:[#allocation3 + $0x68] sm:$0xff]  ;;  %v287_v6 = vld [vmem:[#allocation3 + $0xe0] sm:$0xff]  ;;  %v286_v8 = vld [vmem:[#allocation3 + $0xd8] sm:$0xff]  ;;  %s249_s25 = scalar_select %p248_p9, %s1548_s22, 1 }
  0x36   : > { %1127 = vmatpush3.msra.mxu1 %v273_v1  ;;  %1093 = vmatprep.subr.mxu0 %v289_v2  ;;  %v270_v7 = vld [vmem:[#allocation3 + $0x60] sm:$0xff]  ;;  %v269_v9 = vld [vmem:[#allocation3 + $0x58] sm:$0xff]  ;;  %v285_v10 = vld [vmem:[#allocation3 + $0xd0] sm:$0xff]  ;;  %s973_s11 = sshll.u32 %s245_s10, 4  ;;  %s1494_s22 = smov [#allocation8]  }
  0x37   : > { %1128 = vmatprep.subr.mxu1 %v272_v3  ;;  %1094 = vmatpush3.msra.mxu0 %v289_v2  ;;  %v268_v11 = vld [vmem:[#allocation3 + $0x50] sm:$0xff]  ;;  %v284_v12 = vld [vmem:[#allocation3 + $0xc8] sm:$0xff]  ;;  %v283_v14 = vld [vmem:[#allocation3 + $0xc0] sm:$0xff]  ;;  %s1301_s26 = smul.u32 24, %s249_s25  ;;  %s247_s14 = scalar_lea.vmem [#allocation8], %s973_s11 }
  0x38   : > { %1129 = vmatpush3.msra.mxu1 %v272_v3  ;;  %1095 = vmatprep.subr.mxu0 %v288_v4  ;;  %v267_v13 = vld [vmem:[#allocation3 + $0x48] sm:$0xff]  ;;  %v266_v15 = vld [vmem:[#allocation3 + $0x40] sm:$0xff]  ;;  %v282_v16 = vld [vmem:[#allocation3 + $0xb8] sm:$0xff]  ;;  %s881_s15 = sshll.u32 %s247_s14, 4  ;;  %s1658_s25 = scalar_lea.hbm %s1705_s5, %s982_s16  ;;  %s1653_s15 = int_to_ptr.vmem [resolvable:$true] %s881_s15 }
  0x39   : > { %1130 = vmatprep.subr.mxu1 %v271_v5  ;;  %1096 = vmatpush3.msra.mxu0 %v288_v4  ;;  %v265_v17 = vld [vmem:[#allocation3 + $0x38] sm:$0xff]  ;;  %v281_v18 = vld [vmem:[#allocation3 + $0xb0] sm:$0xff]  ;;  %v280_v20 = vld [vmem:[#allocation3 + $0xa8] sm:$0xff]  ;;  %s1621_s7 = scalar_lea.vmem %s1700_s0, %s1301_s26  ;;  %s1660_s26 = scalar_lea.sflag [#allocation5], %s245_s10 }
  0x3a   : > { %1131 = vmatpush3.msra.mxu1 %v271_v5  ;;  %1097 = vmatprep.subr.mxu0 %v287_v6  ;;  %v264_v19 = vld [vmem:[#allocation3 + $0x30] sm:$0xff]  ;;  %v263_v21 = vld [vmem:[#allocation3 + $0x28] sm:$0xff]  ;;  %v279_v22 = vld [vmem:[#allocation3 + $0xa0] sm:$0xff]  ;;  %s1419_s30 = scalar_lea.vmem %s1653_s15, 256  ;;  %s1423_s6 = sshll.u32 %s1494_s22, 4  ;;  %s1424_s6 = int_to_ptr.vmem [resolvable:$false] %s1423_s6 }
  0x3b   : > { %1132 = vmatprep.subr.mxu1 %v270_v7  ;;  %1098 = vmatpush3.msra.mxu0 %v287_v6  ;;  %v262_v23 = vld [vmem:[#allocation3 + $0x20] sm:$0xff]  ;;  %v278_v24 = vld [vmem:[#allocation3 + $0x98] sm:$0xff]  ;;  %v255_v26 = vld [vmem:[%s1621_s7] sm:$0xff]  ;;  %p1420_p10 = scmp.ne.s32.totalorder %s1653_s15, %s1419_s30  ;;  %p1426_p11 = scmp.lt.s32.totalorder %s1653_s15, %s1424_s6 }
  0x3c   : > { %1133 = vmatpush3.msra.mxu1 %v270_v7  ;;  %1099 = vmatprep.subr.mxu0 %v286_v8  ;;  %v261_v25 = vld [vmem:[#allocation3 + $0x18] sm:$0xff]  ;;  %v1625_v27 = vld [vmem:[%s1621_s7 + $0x8] sm:$0xff]  ;;  %v295_v31 = vrot.slane %v255_v26, 1  ;;  %v276_v33 = vld [vmem:[#allocation3 + $0x88] sm:$0xff]  ;;  %v470_v38 = vrot.slane %v255_v26, 2 }
  0x3d   : > { %1134 = vmatprep.subr.mxu1 %v269_v9  ;;  %1100 = vmatpush3.msra.mxu0 %v286_v8  ;;  %v277_v28 = vld [vmem:[#allocation3 + $0x90] sm:$0xff]  ;;  %v1628_v30 = vld [vmem:[%s1621_s7 + $0x10] sm:$0x3]  ;;  %v296_v32 = vrot.slane %v1625_v27, 1  ;;  %v259_v34 = vld [vmem:[#allocation3 + $0x8] sm:$0xff]  ;;  %v471_v39 = vrot.slane %v1625_v27, 2  ;;  %p1421_p12 = pnand %p1420_p10, %p1565_p5 }
  0x3e   : > { %1135 = vmatpush3.msra.mxu1 %v269_v9  ;;  %1101 = vmatprep.subr.mxu0 %v285_v10  ;;  %v260_v29 = vld [vmem:[#allocation3 + $0x10] sm:$0xff]  ;;  %v298_v35 = vrot.slane %v1628_v30, 1  ;;  %v275_v36 = vld [vmem:[#allocation3 + $0x80] sm:$0xff]  ;;  %v468_v42 = vld [vmem:[#allocation3 + $0x178] sm:$0xff]  ;;  %v473_v58 = vrot.slane %v1628_v30, 2 }
  0x3f   : > { %1136 = vmatprep.subr.mxu1 %v268_v11  ;;  %1102 = vmatpush3.msra.mxu0 %v285_v10  ;;  %v258_v37 = vld [vmem:[#allocation3] sm:$0xff]  ;;  %v297_v40 = vsel %vm294_vm0, %v295_v31, %v296_v32  ;;  %v472_v43 = vsel %vm469_vm1, %v470_v38, %v471_v39  ;;  %v467_v44 = vld [vmem:[#allocation3 + $0x170] sm:$0xff]  ;;  %v466_v45 = vld [vmem:[#allocation3 + $0x168] sm:$0xff]  ;;  %p1422_p8 = pneg %p1421_p12 }
  0x40   : > { %1137 = vmatpush3.msra.mxu1 %v268_v11  ;;  %1103 = vmatprep.subr.mxu0 %v284_v12  ;;  %v299_v41 = vsel %vm294_vm0, %v296_v32, %v298_v35  ;;  %v465_v46 = vld [vmem:[#allocation3 + $0x160] sm:$0xff]  ;;  %v464_v47 = vld [vmem:[#allocation3 + $0x158] sm:$0xff]  ;;  %v463_v48 = vld [vmem:[#allocation3 + $0x150] sm:$0xff]  ;;  %v474_v60 = vsel %vm469_vm1, %v471_v39, %v473_v58 }
  0x41   : > { %1138 = vmatprep.subr.mxu1 %v267_v13  ;;  %1104 = vmatpush3.msra.mxu0 %v284_v12  ;;  %v462_v49 = vld [vmem:[#allocation3 + $0x148] sm:$0xff]  ;;  %v461_v50 = vld [vmem:[#allocation3 + $0x140] sm:$0xff]  ;;  %v460_v51 = vld [vmem:[#allocation3 + $0x138] sm:$0xff] }
  0x42   : > { %1139 = vmatpush3.msra.mxu1 %v267_v13  ;;  %1105 = vmatprep.subr.mxu0 %v283_v14  ;;  %v459_v52 = vld [vmem:[#allocation3 + $0x130] sm:$0xff]  ;;  %v458_v53 = vld [vmem:[#allocation3 + $0x128] sm:$0xff]  ;;  %v457_v54 = vld [vmem:[#allocation3 + $0x120] sm:$0xff] }
  0x43   : > { %1140 = vmatprep.subr.mxu1 %v266_v15  ;;  %1106 = vmatpush3.msra.mxu0 %v283_v14  ;;  %v456_v55 = vld [vmem:[#allocation3 + $0x118] sm:$0xff]  ;;  %v455_v56 = vld [vmem:[#allocation3 + $0x110] sm:$0xff]  ;;  %v454_v57 = vld [vmem:[#allocation3 + $0x108] sm:$0xff] }
  0x44   : > { %1141 = vmatpush3.msra.mxu1 %v266_v15  ;;  %1107 = vmatprep.subr.mxu0 %v282_v16  ;;  %v453_v59 = vld [vmem:[#allocation3 + $0x100] sm:$0xff]  ;;  %v603_v61 = vld [vmem:[#allocation6 + $0xf8] sm:$0xff]  ;;  %v602_v63 = vld [vmem:[#allocation6 + $0xf0] sm:$0xff] }
  0x45   : > { %1142 = vmatprep.subr.mxu1 %v265_v17  ;;  %1108 = vmatpush3.msra.mxu0 %v282_v16  ;;  %v584_v62 = vld [vmem:[#allocation6 + $0x78] sm:$0xff]  ;;  %v583_v0 = vld [vmem:[#allocation6 + $0x70] sm:$0xff]  ;;  %v601_v1 = vld [vmem:[#allocation6 + $0xe8] sm:$0xff] }
  0x46   : > { %1143 = vmatpush3.msra.mxu1 %v265_v17  ;;  %1109 = vmatprep.subr.mxu0 %v281_v18  ;;  %v582_v2 = vld [vmem:[#allocation6 + $0x68] sm:$0xff]  ;;  %v600_v3 = vld [vmem:[#allocation6 + $0xe0] sm:$0xff]  ;;  %v599_v5 = vld [vmem:[#allocation6 + $0xd8] sm:$0xff] }
  0x47   : > { %1144 = vmatprep.subr.mxu1 %v264_v19  ;;  %1110 = vmatpush3.msra.mxu0 %v281_v18  ;;  %v581_v4 = vld [vmem:[#allocation6 + $0x60] sm:$0xff]  ;;  %v580_v6 = vld [vmem:[#allocation6 + $0x58] sm:$0xff]  ;;  %v598_v7 = vld [vmem:[#allocation6 + $0xd0] sm:$0xff] }
  0x48   : > { %1145 = vmatpush3.msra.mxu1 %v264_v19  ;;  %1111 = vmatprep.subr.mxu0 %v280_v20  ;;  %v579_v8 = vld [vmem:[#allocation6 + $0x50] sm:$0xff]  ;;  %v597_v9 = vld [vmem:[#allocation6 + $0xc8] sm:$0xff]  ;;  %v596_v11 = vld [vmem:[#allocation6 + $0xc0] sm:$0xff] }
  0x49   : > { %1146 = vmatprep.subr.mxu1 %v263_v21  ;;  %1112 = vmatpush3.msra.mxu0 %v280_v20  ;;  %v578_v10 = vld [vmem:[#allocation6 + $0x48] sm:$0xff]  ;;  %v595_v12 = vld [vmem:[#allocation6 + $0xb8] sm:$0xff]  ;;  %v594_v13 = vld [vmem:[#allocation6 + $0xb0] sm:$0xff] }
  0x4a   : > { %1147 = vmatpush3.msra.mxu1 %v263_v21  ;;  %1113 = vmatprep.subr.mxu0 %v279_v22  ;;  %v593_v14 = vld [vmem:[#allocation6 + $0xa8] sm:$0xff]  ;;  %v592_v15 = vld [vmem:[#allocation6 + $0xa0] sm:$0xff]  ;;  %v591_v17 = vld [vmem:[#allocation6 + $0x98] sm:$0xff] }
  0x4b   : > { %1148 = vmatprep.subr.mxu1 %v262_v23  ;;  %1114 = vmatpush3.msra.mxu0 %v279_v22  ;;  %v577_v16 = vld [vmem:[#allocation6 + $0x40] sm:$0xff]  ;;  %v576_v18 = vld [vmem:[#allocation6 + $0x38] sm:$0xff]  ;;  %v590_v19 = vld [vmem:[#allocation6 + $0x90] sm:$0xff] }
  0x4c   : > { %1149 = vmatpush3.msra.mxu1 %v262_v23  ;;  %1115 = vmatprep.subr.mxu0 %v278_v24  ;;  %v575_v20 = vld [vmem:[#allocation6 + $0x30] sm:$0xff]  ;;  %v589_v21 = vld [vmem:[#allocation6 + $0x88] sm:$0xff]  ;;  %v588_v23 = vld [vmem:[#allocation6 + $0x80] sm:$0xff] }
  0x4d   : > { %1150 = vmatprep.subr.mxu1 %v261_v25  ;;  %1116 = vmatpush3.msra.mxu0 %v278_v24  ;;  %v574_v22 = vld [vmem:[#allocation6 + $0x28] sm:$0xff]  ;;  %v573_v24 = vld [vmem:[#allocation6 + $0x20] sm:$0xff] }
  0x4e   : > { %1151 = vmatpush3.msra.mxu1 %v261_v25  ;;  %1117 = vmatprep.subr.mxu0 %v277_v28  ;;  %v1493_v25 = vmov 0.0   ;;  %v569_v30 = vld [vmem:[#allocation6] sm:$0xff]  ;;  %v762_v58 = vld [vmem:[#allocation6 + $0x128] sm:$0xff] }
  0x4f   : > { %1152 = vmatprep.subr.mxu1 %v260_v29  ;;  %1118 = vmatpush3.msra.mxu0 %v277_v28  ;;  %253 = vst [vmem:[#allocation2] sm:$0x1] %v1493_v25  ;;  %254 = vst [vmem:[#allocation2 + $0x11] sm:$0x1] %v1493_v25  ;;  %v571_v28 = vld [vmem:[#allocation6 + $0x10] sm:$0xff] }
  0x50   : > { %1153 = vmatpush3.msra.mxu1 %v260_v29  ;;  %1119 = vmatprep.subr.mxu0 %v276_v33  ;;  %v570_v29 = vld [vmem:[#allocation6 + $0x8] sm:$0xff] }
  0x51   : > { %1154 = vmatprep.subr.mxu1 %v259_v34  ;;  %1120 = vmatpush3.msra.mxu0 %v276_v33 }
  0x52   : > { %1155 = vmatpush3.msra.mxu1 %v259_v34  ;;  %1121 = vmatprep.subr.mxu0 %v275_v36 }
  0x53   : > { %1156 = vmatprep.subr.mxu1 %v258_v37  ;;  %1122 = vmatpush3.msra.mxu0 %v275_v36 }
  0x54   : > { %1123 = vmatprep.mubr.f32.mxu0 %v297_v40  ;;  %1157 = vmatpush3.msra.mxu1 %v258_v37  ;;  %v975_v37 = vld [vmem:[%s1703_s3] ss:$0 sm:$0xff] }
  0x55   : > { %1158 = vmatprep.mubr.f32.mxu1 %v255_v26  ;;  %1124 = vmatmul.mubr.f32.vlgmr.msra.gmra.mxu0 %v299_v41  ;;  %v772_v26 = vld [vmem:[#allocation6 + $0x178] sm:$0xff] }
  0x56   : > { %1159 = vmatmul.mubr.f32.vlgmr.msra.gmra.mxu1 %v1625_v27  ;;  %1161 = vmatprep.subr.mxu0 %v468_v42  ;;  %v572_v27 = vld [vmem:[#allocation6 + $0x18] sm:$0xff] }
  0x57   : > { %1193 = vmatprep.mubr.f32.mxu0 %v472_v43  ;;  %1162 = vmatpush3.msra.mxu0 %v468_v42 }
  0x58   : > { %1163 = vmatprep.subr.mxu0 %v467_v44  ;;  %1196 = vmatprep.subr.mxu1 %v603_v61 }
  0x59   : > { %1164 = vmatpush3.msra.mxu0 %v467_v44  ;;  %1197 = vmatpush3.msra.mxu1 %v603_v61  ;;  %v759_v61 = vld [vmem:[#allocation6 + $0x110] sm:$0xff] }
  0x5a   : > { %1165 = vmatprep.subr.mxu0 %v466_v45  ;;  %1198 = vmatprep.subr.mxu1 %v602_v63 }
  0x5b   : > { %1166 = vmatpush3.msra.mxu0 %v466_v45  ;;  %1199 = vmatpush3.msra.mxu1 %v602_v63  ;;  %v757_v63 = vld [vmem:[#allocation6 + $0x100] sm:$0xff] }
  0x5c   : > { %1167 = vmatprep.subr.mxu0 %v465_v46  ;;  %1200 = vmatprep.subr.mxu1 %v601_v1 }
  0x5d   : > { %1168 = vmatpush3.msra.mxu0 %v465_v46  ;;  %1201 = vmatpush3.msra.mxu1 %v601_v1  ;;  %v771_v46 = vld [vmem:[#allocation6 + $0x170] sm:$0xff] }
  0x5e   : > { %1169 = vmatprep.subr.mxu0 %v464_v47  ;;  %1202 = vmatprep.subr.mxu1 %v600_v3 }
  0x5f   : > { %1170 = vmatpush3.msra.mxu0 %v464_v47  ;;  %1203 = vmatpush3.msra.mxu1 %v600_v3  ;;  %v770_v47 = vld [vmem:[#allocation6 + $0x168] sm:$0xff] }
  0x60   : > { %1171 = vmatprep.subr.mxu0 %v463_v48  ;;  %1204 = vmatprep.subr.mxu1 %v599_v5 }
  0x61   : > { %1172 = vmatpush3.msra.mxu0 %v463_v48  ;;  %1205 = vmatpush3.msra.mxu1 %v599_v5  ;;  %v769_v48 = vld [vmem:[#allocation6 + $0x160] sm:$0xff] }
  0x62   : > { %1173 = vmatprep.subr.mxu0 %v462_v49  ;;  %1206 = vmatprep.subr.mxu1 %v598_v7 }
  0x63   : > { %1174 = vmatpush3.msra.mxu0 %v462_v49  ;;  %1207 = vmatpush3.msra.mxu1 %v598_v7  ;;  %v768_v49 = vld [vmem:[#allocation6 + $0x158] sm:$0xff]  ;;  %v976_v7 = vld [vmem:[%s1704_s4] ss:$0 sm:$0xff] }
  0x64   : > { %1175 = vmatprep.subr.mxu0 %v461_v50  ;;  %1208 = vmatprep.subr.mxu1 %v597_v9 }
  0x65   : > { %1176 = vmatpush3.msra.mxu0 %v461_v50  ;;  %1209 = vmatpush3.msra.mxu1 %v597_v9 }
  0x66   : > { %1177 = vmatprep.subr.mxu0 %v460_v51  ;;  %1210 = vmatprep.subr.mxu1 %v596_v11 }
  0x67   : > { %1178 = vmatpush3.msra.mxu0 %v460_v51  ;;  %1211 = vmatpush3.msra.mxu1 %v596_v11 }
  0x68   : > { %1179 = vmatprep.subr.mxu0 %v459_v52  ;;  %1212 = vmatprep.subr.mxu1 %v595_v12 }
  0x69   : > { %1180 = vmatpush3.msra.mxu0 %v459_v52  ;;  %1213 = vmatpush3.msra.mxu1 %v595_v12 }
  0x6a   : > { %1181 = vmatprep.subr.mxu0 %v458_v53  ;;  %1214 = vmatprep.subr.mxu1 %v594_v13 }
  0x6b   : > { %1182 = vmatpush3.msra.mxu0 %v458_v53  ;;  %1215 = vmatpush3.msra.mxu1 %v594_v13  ;;  %v767_v53 = vld [vmem:[#allocation6 + $0x150] sm:$0xff] }
  0x6c   : > { %1183 = vmatprep.subr.mxu0 %v457_v54  ;;  %1216 = vmatprep.subr.mxu1 %v593_v14 }
  0x6d   : > { %1184 = vmatpush3.msra.mxu0 %v457_v54  ;;  %1217 = vmatpush3.msra.mxu1 %v593_v14  ;;  %v766_v54 = vld [vmem:[#allocation6 + $0x148] sm:$0xff] }
  0x6e   : > { %1185 = vmatprep.subr.mxu0 %v456_v55  ;;  %1218 = vmatprep.subr.mxu1 %v592_v15  ;;  %v850_v14 = vld [vmem:[%s1621_s7 + $0x1] sm:$0xff] }
  0x6f   : > { %1186 = vmatpush3.msra.mxu0 %v456_v55  ;;  %1219 = vmatpush3.msra.mxu1 %v592_v15  ;;  %v765_v55 = vld [vmem:[#allocation6 + $0x140] sm:$0xff] }
  0x70   : > { %1187 = vmatprep.subr.mxu0 %v455_v56  ;;  %1220 = vmatprep.subr.mxu1 %v591_v17 }
  0x71   : > { %1188 = vmatpush3.msra.mxu0 %v455_v56  ;;  %1221 = vmatpush3.msra.mxu1 %v591_v17  ;;  %v764_v56 = vld [vmem:[#allocation6 + $0x138] sm:$0xff] }
  0x72   : > { %1189 = vmatprep.subr.mxu0 %v454_v57  ;;  %1222 = vmatprep.subr.mxu1 %v590_v19 }
  0x73   : > { %1190 = vmatpush3.msra.mxu0 %v454_v57  ;;  %1223 = vmatpush3.msra.mxu1 %v590_v19  ;;  %v763_v57 = vld [vmem:[#allocation6 + $0x130] sm:$0xff] }
  0x74   : > { %1191 = vmatprep.subr.mxu0 %v453_v59  ;;  %1224 = vmatprep.subr.mxu1 %v589_v21 }
  0x75   : > { %1192 = vmatpush3.msra.mxu0 %v453_v59  ;;  %1225 = vmatpush3.msra.mxu1 %v589_v21  ;;  %v761_v59 = vld [vmem:[#allocation6 + $0x120] sm:$0xff] }
  0x76   : > { %1194 = vmatmul.mubr.f32.vlgmr.msra.gmra.mxu0 %v474_v60  ;;  %1231 = vmatprep.subr.mxu0 %v584_v62  ;;  %v760_v60 = vld [vmem:[#allocation6 + $0x118] sm:$0xff] }
  0x77   : > { %1232 = vmatpush3.msra.mxu0 %v584_v62  ;;  %1226 = vmatprep.subr.mxu1 %v588_v23  ;;  %v758_v62 = vld [vmem:[#allocation6 + $0x108] sm:$0xff] }
  0x78   : > { %1233 = vmatprep.subr.mxu0 %v583_v0  ;;  %1227 = vmatpush3.msra.mxu1 %v588_v23 }
  0x79   : > { %1234 = vmatpush3.msra.mxu0 %v583_v0  ;;  %1266 = vmatprep.subr.mxu1 %v772_v26 }
  0x7a   : > { %1235 = vmatprep.subr.mxu0 %v582_v2 }
  0x7b   : > { %1236 = vmatpush3.msra.mxu0 %v582_v2 }
  0x7c   : > { %1237 = vmatprep.subr.mxu0 %v581_v4 }
  0x7d   : > { %1238 = vmatpush3.msra.mxu0 %v581_v4 }
  0x7e   : > { %1239 = vmatprep.subr.mxu0 %v580_v6 }
  0x7f   : > { %1240 = vmatpush3.msra.mxu0 %v580_v6 }
  0x80   : > { %1241 = vmatprep.subr.mxu0 %v579_v8 }
  0x81   : > { %1242 = vmatpush3.msra.mxu0 %v579_v8 }
  0x82   : > { %1243 = vmatprep.subr.mxu0 %v578_v10 }
  0x83   : > { %1244 = vmatpush3.msra.mxu0 %v578_v10  ;;  %v851_v10 = vld [vmem:[%s1621_s7 + $0x9] sm:$0xff]  ;;  %s1425_s7 = scalar_lea.vmem %s1424_s6, 512 }
  0x84   : > { %1245 = vmatprep.subr.mxu0 %v577_v16  ;;  %p1427_p0 = scmp.lt.s32.totalorder %s1425_s7, %s1419_s30 }
  0x85   : > { %1246 = vmatpush3.msra.mxu0 %v577_v16 }
  0x86   : > { %1247 = vmatprep.subr.mxu0 %v576_v18  ;;  %p1428_p1 = por %p1427_p0, %p1426_p11 }
  0x87   : > { %1248 = vmatpush3.msra.mxu0 %v576_v18 }
  0x88   : > { %1249 = vmatprep.subr.mxu0 %v575_v20  ;;  %p1429_p3 = pnand %p1428_p1, %p1422_p8 }
  0x89   : > { %1250 = vmatpush3.msra.mxu0 %v575_v20 }
  0x8a   : > { %1251 = vmatprep.subr.mxu0 %v574_v22 }
  0x8b   : > { %1252 = vmatpush3.msra.mxu0 %v574_v22 }
  0x8c   : > { %1253 = vmatprep.subr.mxu0 %v573_v24 }
  0x8d   : > { %1254 = vmatpush3.msra.mxu0 %v573_v24 }
  0x8e   : > { %1255 = vmatprep.subr.mxu0 %v572_v27 }
  0x8f   : > { %1256 = vmatpush3.msra.mxu0 %v572_v27 }
  0x90   : > { %1257 = vmatprep.subr.mxu0 %v571_v28 }
  0x91   : > { %1258 = vmatpush3.msra.mxu0 %v571_v28 }
  0x92   : > { %1259 = vmatprep.subr.mxu0 %v570_v29 }
  0x93   : > { %1260 = vmatpush3.msra.mxu0 %v570_v29 }
  0x94   : > { %1261 = vmatprep.subr.mxu0 %v569_v30 }
  0x95   : > { %1262 = vmatpush3.msra.mxu0 %v569_v30 }
 0x115   : > { %v1125_v31 = vpop.f32.mrf.mxu0 }
 0x116   : > { %v1160_v32 = vpop.f32.mrf.mxu1 }
 0x117   : > { %v368_v33 = vpop.f32.mrf.mxu0  ;;  %v449_v35 = vadd.f32 %v1160_v32, %v1125_v31 }
 0x118   : > { %v443_v34 = vpop.f32.mrf.mxu1 }
 0x119   : > { %v444_v38 = vadd.f32 %v443_v34, %v368_v33 }
 0x136   : > { %v1195_v36 = vpop.f32.mrf.mxu0 }
 0x137   : > { %v553_v39 = vadd.f32 %v1195_v36, %v449_v35 }
 0x138   : > { %v543_v40 = vpop.f32.mrf.mxu0 }
 0x139   : > { %v562_v41 = vadd.f32 %v975_v37, %v553_v39  ;;  %v552_v42 = vadd.f32 %v543_v40, %v444_v38 }
 0x13b   : > { %v564_v43 = vmax.f32 %v562_v41, 0.0  ;;  %v561_v44 = vadd.f32 %v975_v37, %v552_v42 }
 0x13d   : > { %566 = vst [vmem:[#allocation2 + $0x9] sm:$0xff] %v564_v43  ;;  %v563_v45 = vmax.f32 %v561_v44, 0.0 }
 0x13f   : > { %565 = vst [vmem:[#allocation2 + $0x1] sm:$0xff] %v563_v45  ;;  %1228 = vmatprep.mubr.f32.mxu1 %v563_v45 }
 0x140   : > { %1229 = vmatmul.mubr.f32.vlgmr.msra.gmra.mxu1 %v564_v43 }
 0x141   : > { %1267 = vmatpush3.msra.mxu1 %v772_v26 }
 0x142   : > { %1268 = vmatprep.subr.mxu1 %v771_v46 }
 0x143   : > { %1269 = vmatpush3.msra.mxu1 %v771_v46 }
 0x144   : > { %1270 = vmatprep.subr.mxu1 %v770_v47  ;;  %v755_v0 = vld [vmem:[#allocation2 + $0xa] sm:$0xff] }
 0x145   : > { %1271 = vmatpush3.msra.mxu1 %v770_v47 }
 0x146   : > { %v567_v50 = vld [vmem:[#allocation2] sm:$0xff]  ;;  %v568_v51 = vld [vmem:[#allocation2 + $0x8] sm:$0xff]  ;;  %1272 = vmatprep.subr.mxu1 %v769_v48 }
 0x147   : > { %v754_v52 = vld [vmem:[#allocation2 + $0x2] sm:$0xff]  ;;  %1263 = vmatprep.mubr.f32.mxu0 %v567_v50  ;;  %1273 = vmatpush3.msra.mxu1 %v769_v48 }
 0x148   : > { %1298 = vmatprep.mubr.f32.mxu1 %v754_v52  ;;  %1264 = vmatmul.mubr.f32.vlgmr.msra.gmra.mxu0 %v568_v51 }
 0x149   : > { %1274 = vmatprep.subr.mxu1 %v768_v49 }
 0x14a   : > { %1275 = vmatpush3.msra.mxu1 %v768_v49 }
 0x14b   : > { %1276 = vmatprep.subr.mxu1 %v767_v53 }
 0x14c   : > { %1277 = vmatpush3.msra.mxu1 %v767_v53 }
 0x14d   : > { %1278 = vmatprep.subr.mxu1 %v766_v54 }
 0x14e   : > { %1279 = vmatpush3.msra.mxu1 %v766_v54 }
 0x14f   : > { %1280 = vmatprep.subr.mxu1 %v765_v55 }
 0x150   : > { %1281 = vmatpush3.msra.mxu1 %v765_v55 }
 0x151   : > { %1282 = vmatprep.subr.mxu1 %v764_v56 }
 0x152   : > { %1283 = vmatpush3.msra.mxu1 %v764_v56 }
 0x153   : > { %1284 = vmatprep.subr.mxu1 %v763_v57 }
 0x154   : > { %1285 = vmatpush3.msra.mxu1 %v763_v57 }
 0x155   : > { %1286 = vmatprep.subr.mxu1 %v762_v58 }
 0x156   : > { %1287 = vmatpush3.msra.mxu1 %v762_v58 }
 0x157   : > { %1288 = vmatprep.subr.mxu1 %v761_v59 }
 0x158   : > { %1289 = vmatpush3.msra.mxu1 %v761_v59 }
 0x159   : > { %1290 = vmatprep.subr.mxu1 %v760_v60 }
 0x15a   : > { %1291 = vmatpush3.msra.mxu1 %v760_v60 }
 0x15b   : > { %1292 = vmatprep.subr.mxu1 %v759_v61 }
 0x15c   : > { %1293 = vmatpush3.msra.mxu1 %v759_v61 }
 0x15d   : > { %1294 = vmatprep.subr.mxu1 %v758_v62 }
 0x15e   : > { %1295 = vmatpush3.msra.mxu1 %v758_v62 }
 0x15f   : > { %1296 = vmatprep.subr.mxu1 %v757_v63 }
 0x160   : > { %1297 = vmatpush3.msra.mxu1 %v757_v63 }
 0x161   : > { %1299 = vmatmul.mubr.f32.vlgmr.msra.gmra.mxu1 %v755_v0 }
 0x200   : > { %v1230_v1 = vpop.f32.mrf.mxu1 }
 0x202   : > { %v670_v3 = vpop.f32.mrf.mxu1 }
 0x208   : > { %v1265_v2 = vpop.f32.mrf.mxu0 }
 0x209   : > { %v751_v5 = vadd.f32 %v1265_v2, %v1230_v1 }
 0x20a   : > { %v745_v4 = vpop.f32.mrf.mxu0 }
 0x20b   : > { %v746_v8 = vadd.f32 %v745_v4, %v670_v3 }
 0x221   : > { %v1300_v6 = vpop.f32.mrf.mxu1 }
 0x222   : > { %v849_v9 = vadd.f32 %v1300_v6, %v751_v5 }
 0x223   : > { %v839_v11 = vpop.f32.mrf.mxu1 }
 0x224   : > { %v860_v12 = vadd.f32 %v976_v7, %v849_v9  ;;  %v848_v13 = vadd.f32 %v839_v11, %v746_v8 }
 0x226   : > { %v862_v15 = vadd.f32 %v860_v12, %v851_v10  ;;  %v859_v16 = vadd.f32 %v976_v7, %v848_v13 }
 0x228   : > { %v864_v17 = vmax.f32 %v862_v15, 0.0  ;;  %v861_v18 = vadd.f32 %v859_v16, %v850_v14 }
 0x22a   : > { %866 = vst [vmem:[%s247_s14 + $0x8] sm:$0xff] %v864_v17  ;;  %v863_v19 = vmax.f32 %v861_v18, 0.0 }
 0x22c   : > { %865 = vst [vmem:[%s247_s14] sm:$0xff] %v863_v19 }
 0x22d   : > { %1432 = shalt.err (!%p1429_p3)
}
 0x22e   : > { %s1433_s8 = scalar_lea.hbm %s1658_s25, 256  ;;  %s1437_s11 = scalar_lea.hbm %s1705_s5, 512 }
 0x22f   : > { %p1434_p2 = scmp.ne.s32.totalorder %s1658_s25, %s1433_s8  ;;  %p1438_p7 = scmp.lt.s32.totalorder %s1658_s25, %s1705_s5 }
 0x230   : > { %p1439_p6 = scmp.lt.s32.totalorder %s1437_s11, %s1433_s8 }
 0x231   : > { %p1435_p4 = pnand %p1434_p2, %p1565_p5 }
 0x232   : > { %p1440_p9 = por %p1439_p6, %p1438_p7 }
 0x233   : > { %p1436_p13 = pneg %p1435_p4 }
 0x235   : > { %p1441_p10 = pnand %p1440_p9, %p1436_p13 }
 0x237   : > { %1444 = shalt.err (!%p1441_p10)
}
 0x238   : > { %s1495_s14 = smov 128   ;;  %s1496_s16 = smov 8  }
 0x239   : > { %1310 = dma.vmem_to_hbm [thread:$0]  (%p1565_p5), %s1653_s15, 256, %s1658_s25, %s1660_s26, %s1495_s14, %s1495_s14, %s1496_s16  }
 0x23a PF: > { %p1327_p12 = scmp.ge.s32.totalorder %s1487_s21, 2  ;;  %s896_s17 = sand.u32 1, %s1475_s18  }
 0x23b   : > { %p1715_p8 = scmp.ne.s32.totalorder %s1708_s29, 0  ;;  %s897_s23 = scalar_lea.sflag [#allocation5], %s896_s17 }
 0x23d   : > { %p1320_p11 = pnand %p1327_p12, %p1715_p8 }
 0x23f   : > { %p1321_p0 = pneg %p1320_p11 }
 0x241   : > { %1470 = dma.done.wait (%p1321_p0), %s897_s23, 256  }
 0x242   : > { %1472 = vsyncadd (%p1321_p0), %s897_s23, 4294967040  ;;  %p17_p1 = scmp.ge.s32.totalorder %s1552_s24, 4   ;;  %s1716_s18 = smov %s1479_s19 }
 0x243   : > { %s1717_s19 = smov %s1483_s20  ;;  %s1718_s20 = smov %s1563_s27 }
 0x244   : > { %s1719_s21 = smov %s1552_s24  ;;  %19 = sbr.rel (!%p17_p1) target bundleno = 5 (0x5), region = 88 }
 0x249   :  { %902 = vsyncpa [#allocation4], 1 }
 0x24a   :  { %904 = vsyncpa [#allocation4 + $0x1], 1 }
 0x24b   :  { %905 = vsyncpa [#allocation7], 1 }
 0x24c   :  { %906 = vsyncpa [#allocation5], 1 }
 0x24d   :  { %908 = vsyncpa [#allocation5 + $0x1], 1 }

</bundles_post_ra>
